<compile_context>
chip_gen: v6e
topology: v6e:2x2x1
jax: 0.10.0
libtpu: 0.0.40
codegen_flags: <defaults>
</compile_context>

<pallas_src>
import jax
import jax.numpy as jnp
from jax.experimental import pallas as pl
from jax.experimental.pallas import tpu as pltpu


def _round_up(n, m):
    return ((n + m - 1) // m) * m


def policy_net_kernel(x_ref, w1_ref, b1_ref, w2_ref, b2_ref, w3_ref, b3_ref, o_ref):
    cdt = w1_ref.dtype  # MXU operand dtype (bf16 by default, f32 optional)
    # Layer 1: Linear + ReLU (f32 accumulation, f32 epilogue)
    h = jnp.dot(x_ref[...], w1_ref[...], preferred_element_type=jnp.float32)
    h = jnp.maximum(h + b1_ref[...], 0.0)
    # Layer 2: Linear + ReLU
    h = jnp.dot(h.astype(cdt), w2_ref[...], preferred_element_type=jnp.float32)
    h = jnp.maximum(h + b2_ref[...], 0.0)
    # Layer 3: Linear (no activation)
    out = jnp.dot(h.astype(cdt), w3_ref[...], preferred_element_type=jnp.float32)
    o_ref[...] = (out + b3_ref[...]).astype(o_ref.dtype)


def policy_net_forward(x, w1, b1, w2, b2, w3, b3, *,
                       compute_dtype=jnp.bfloat16, batch_tile=1024):
    """x: (B, size) f32; returns (B, n_actions) f32.

    Weights wN are (in, out); biases bN are (out,) or (1, out).
    compute_dtype controls only the MXU operand dtype; accumulation, bias add,
    ReLU and the output are always float32.
    """
    B, S = x.shape
    A = w3.shape[1]
    f32 = jnp.float32

    # Batch tile: multiple of 16 (full packed bf16 vreg rows; also ok for f32).
    TB = min(batch_tile, _round_up(max(B, 1), 16))
    n_tiles = pl.cdiv(B, TB)

    # Single cast, no HBM-side padding of x, weights or output.
    xc = x.astype(compute_dtype)
    w1c = w1.astype(compute_dtype)
    w2c = w2.astype(compute_dtype)
    w3c = w3.astype(compute_dtype)
    b1c = jnp.reshape(b1, (1, -1)).astype(f32)
    b2c = jnp.reshape(b2, (1, -1)).astype(f32)
    b3c = jnp.reshape(b3, (1, -1)).astype(f32)

    op_bytes = jnp.dtype(compute_dtype).itemsize
    flops = 2 * B * (2 * S * S + S * A)
    bytes_accessed = (
        B * S * op_bytes                      # x streamed in
        + (2 * S * S + S * A) * op_bytes      # weights (VMEM-resident, fetched once)
        + (2 * S + A) * 4                     # f32 biases
        + B * A * 4                           # f32 output streamed out
    )

    const = lambda shape: pl.BlockSpec(shape, lambda i: (0, 0))

    out = pl.pallas_call(
        policy_net_kernel,
        out_shape=jax.ShapeDtypeStruct((B, A), f32),
        grid_spec=pl.GridSpec(
            grid=(n_tiles,),
            in_specs=[
                pl.BlockSpec((TB, S), lambda i: (i, 0)),   # x: streamed over batch
                const((S, S)), const((1, S)),              # layer 1 (resident)
                const((S, S)), const((1, S)),              # layer 2 (resident)
                const((S, A)), const((1, A)),              # layer 3 (resident)
            ],
            out_specs=pl.BlockSpec((TB, A), lambda i: (i, 0)),
        ),
        compiler_params=pltpu.CompilerParams(
            dimension_semantics=("parallel",),   # batch axis: shards across v7x's 2 TCs
            vmem_limit_bytes=32 * 1024 * 1024,   # headroom over v5e's 16 MiB scoped default
        ),
        cost_estimate=pl.CostEstimate(
            flops=flops, transcendentals=0, bytes_accessed=bytes_accessed),
    )(xc, w1c, b1c, w2c, b2c, w3c, b3c)

    return out


def ref_forward(x, w1, b1, w2, b2, w3, b3, compute_dtype=jnp.bfloat16):
    """Plain-JAX reference with identical dtype handling."""
    c = compute_dtype
    h = jnp.dot(x.astype(c), w1.astype(c), preferred_element_type=jnp.float32)
    h = jnp.maximum(h + jnp.reshape(b1, (1, -1)).astype(jnp.float32), 0.0)
    h = jnp.dot(h.astype(c), w2.astype(c), preferred_element_type=jnp.float32)
    h = jnp.maximum(h + jnp.reshape(b2, (1, -1)).astype(jnp.float32), 0.0)
    out = jnp.dot(h.astype(c), w3.astype(c), preferred_element_type=jnp.float32)
    return out + jnp.reshape(b3, (1, -1)).astype(jnp.float32)


def init_params(key, size, n_actions):
    """Deterministic init mirroring nn.Linear default (uniform +-1/sqrt(fan_in)).
    Weights are returned already transposed to (in, out)."""
    ks = jax.random.split(key, 6)

    def lin(kw, kb, fan_in, fan_out):
        bound = 1.0 / jnp.sqrt(fan_in)
        w = jax.random.uniform(kw, (fan_in, fan_out), jnp.float32, -bound, bound)
        b = jax.random.uniform(kb, (1, fan_out), jnp.float32, -bound, bound)
        return w, b

    w1, b1 = lin(ks[0], ks[1], size, size)
    w2, b2 = lin(ks[2], ks[3], size, size)
    w3, b3 = lin(ks[4], ks[5], size, n_actions)
    return w1, b1, w2, b2, w3, b3


if __name__ == "__main__":
    key = jax.random.PRNGKey(0)
    k_x, k_p, k_x2 = jax.random.split(key, 3)

    size = 32        # n_input_size
    n_actions = 8
    params = init_params(k_p, size, n_actions)

    # 1) Small batch (single grid step, partial block), default bf16 operands.
    x_small = jax.random.normal(k_x, (8, size), jnp.float32)
    out = jax.block_until_ready(policy_net_forward(x_small, *params))
    ref = ref_forward(x_small, *params, compute_dtype=jnp.bfloat16)
    assert out.shape == (8, n_actions)
    assert jnp.allclose(out, ref, atol=2e-2, rtol=2e-2)

    # 2) Larger, non-tile-aligned batch exercising the pipelined batch grid
    #    with a partial tail block (300 = 2*128 + 44).
    x_big = jax.random.normal(k_x2, (300, size), jnp.float32)
    out_big = jax.block_until_ready(
        policy_net_forward(x_big, *params, batch_tile=128))
    ref_big = ref_forward(x_big, *params, compute_dtype=jnp.bfloat16)
    assert out_big.shape == (300, n_actions)
    assert jnp.allclose(out_big, ref_big, atol=2e-2, rtol=2e-2)

    # 3) Exact f32 operand path (tight tolerance sanity check).
    out_f32 = jax.block_until_ready(
        policy_net_forward(x_big, *params, compute_dtype=jnp.float32, batch_tile=128))
    ref_f32 = ref_forward(x_big, *params, compute_dtype=jnp.float32)
    assert jnp.allclose(out_f32, ref_f32, atol=1e-5, rtol=1e-5)

    print("KERNEL_OK")
</pallas_src>

<mosaic_0001>
module attributes {stable_mosaic.version = 11 : i64} {
  func.func @policy_net_kernel(%arg0: i32, %arg1: memref<16x32xbf16, #tpu.memory_space<vmem>>, %arg2: memref<32x32xbf16, #tpu.memory_space<vmem>>, %arg3: memref<1x32xf32, #tpu.memory_space<vmem>>, %arg4: memref<32x32xbf16, #tpu.memory_space<vmem>>, %arg5: memref<1x32xf32, #tpu.memory_space<vmem>>, %arg6: memref<32x8xbf16, #tpu.memory_space<vmem>>, %arg7: memref<1x8xf32, #tpu.memory_space<vmem>>, %arg8: memref<16x8xf32, #tpu.memory_space<vmem>>) attributes {dimension_semantics = [#tpu.dimension_semantics<parallel>], iteration_bounds = array<i64: 1>, scalar_prefetch = 0 : i64, scratch_operands = 0 : i64, tpu.core_type = #tpu.core_type<tc>, window_params = [{transform_indices = @transform_0, window_bounds = array<i64: 16, 32>}, {pipeline_mode = #tpu.pipeline_mode<synchronous>, transform_indices = @transform_1, window_bounds = array<i64: 32, 32>}, {pipeline_mode = #tpu.pipeline_mode<synchronous>, transform_indices = @transform_2, window_bounds = array<i64: 1, 32>}, {pipeline_mode = #tpu.pipeline_mode<synchronous>, transform_indices = @transform_3, window_bounds = array<i64: 32, 32>}, {pipeline_mode = #tpu.pipeline_mode<synchronous>, transform_indices = @transform_4, window_bounds = array<i64: 1, 32>}, {pipeline_mode = #tpu.pipeline_mode<synchronous>, transform_indices = @transform_5, window_bounds = array<i64: 32, 8>}, {pipeline_mode = #tpu.pipeline_mode<synchronous>, transform_indices = @transform_6, window_bounds = array<i64: 1, 8>}, {transform_indices = @transform_7, window_bounds = array<i64: 16, 8>}]} {
    %c0 = arith.constant 0 : index
    %c0_0 = arith.constant 0 : index
    %0 = vector.load %arg1[%c0, %c0_0] : memref<16x32xbf16, #tpu.memory_space<vmem>>, vector<16x32xbf16>
    %c0_1 = arith.constant 0 : index
    %c0_2 = arith.constant 0 : index
    %1 = vector.load %arg2[%c0_1, %c0_2] : memref<32x32xbf16, #tpu.memory_space<vmem>>, vector<32x32xbf16>
    %cst = arith.constant dense<0.000000e+00> : vector<16x32xf32>
    %2 = tpu.matmul %0, %1, %cst {dimension_numbers = #tpu.dot_dimension_numbers<[1], [0], [0], [1], [0, 0, 1, 1], [], []>} : vector<16x32xbf16>, vector<32x32xbf16>, vector<16x32xf32> -> vector<16x32xf32>
    %c0_3 = arith.constant 0 : index
    %c0_4 = arith.constant 0 : index
    %3 = vector.load %arg3[%c0_3, %c0_4] : memref<1x32xf32, #tpu.memory_space<vmem>>, vector<1x32xf32>
    %4 = vector.broadcast %3 : vector<1x32xf32> to vector<16x32xf32>
    %5 = arith.addf %2, %4 : vector<16x32xf32>
    %cst_5 = arith.constant 0.000000e+00 : f32
    %6 = vector.broadcast %cst_5 : f32 to vector<16x32xf32>
    %7 = arith.maximumf %5, %6 : vector<16x32xf32>
    %8 = arith.truncf %7 : vector<16x32xf32> to vector<16x32xbf16>
    %c0_6 = arith.constant 0 : index
    %c0_7 = arith.constant 0 : index
    %9 = vector.load %arg4[%c0_6, %c0_7] : memref<32x32xbf16, #tpu.memory_space<vmem>>, vector<32x32xbf16>
    %cst_8 = arith.constant dense<0.000000e+00> : vector<16x32xf32>
    %10 = tpu.matmul %8, %9, %cst_8 {dimension_numbers = #tpu.dot_dimension_numbers<[1], [0], [0], [1], [0, 0, 1, 1], [], []>} : vector<16x32xbf16>, vector<32x32xbf16>, vector<16x32xf32> -> vector<16x32xf32>
    %c0_9 = arith.constant 0 : index
    %c0_10 = arith.constant 0 : index
    %11 = vector.load %arg5[%c0_9, %c0_10] : memref<1x32xf32, #tpu.memory_space<vmem>>, vector<1x32xf32>
    %12 = vector.broadcast %11 : vector<1x32xf32> to vector<16x32xf32>
    %13 = arith.addf %10, %12 : vector<16x32xf32>
    %cst_11 = arith.constant 0.000000e+00 : f32
    %14 = vector.broadcast %cst_11 : f32 to vector<16x32xf32>
    %15 = arith.maximumf %13, %14 : vector<16x32xf32>
    %16 = arith.truncf %15 : vector<16x32xf32> to vector<16x32xbf16>
    %c0_12 = arith.constant 0 : index
    %c0_13 = arith.constant 0 : index
    %17 = vector.load %arg6[%c0_12, %c0_13] : memref<32x8xbf16, #tpu.memory_space<vmem>>, vector<32x8xbf16>
    %cst_14 = arith.constant dense<0.000000e+00> : vector<16x8xf32>
    %18 = tpu.matmul %16, %17, %cst_14 {dimension_numbers = #tpu.dot_dimension_numbers<[1], [0], [0], [1], [0, 0, 1, 1], [], []>} : vector<16x32xbf16>, vector<32x8xbf16>, vector<16x8xf32> -> vector<16x8xf32>
    %c0_15 = arith.constant 0 : index
    %c0_16 = arith.constant 0 : index
    %19 = vector.load %arg7[%c0_15, %c0_16] : memref<1x8xf32, #tpu.memory_space<vmem>>, vector<1x8xf32>
    %20 = vector.broadcast %19 : vector<1x8xf32> to vector<16x8xf32>
    %21 = arith.addf %18, %20 : vector<16x8xf32>
    %c0_17 = arith.constant 0 : index
    %c0_18 = arith.constant 0 : index
    %22 = vector.load %arg8[%c0_17, %c0_18] : memref<16x8xf32, #tpu.memory_space<vmem>>, vector<16x8xf32>
    tpu.vector_store %arg8[%c0_17, %c0_18], %21 {strides = array<i32>} : memref<16x8xf32, #tpu.memory_space<vmem>>, vector<16x8xf32>,
    return
  }
  func.func @transform_0(%arg0: i32) -> (i32, i32) {
    %c0_i32 = arith.constant 0 : i32
    %c0_i32_0 = arith.constant 0 : i32
    return %arg0, %c0_i32 : i32, i32
  }
  func.func @transform_1(%arg0: i32) -> (i32, i32) {
    %c0_i32 = arith.constant 0 : i32
    %c0_i32_0 = arith.constant 0 : i32
    %c0_i32_1 = arith.constant 0 : i32
    return %c0_i32, %c0_i32_0 : i32, i32
  }
  func.func @transform_2(%arg0: i32) -> (i32, i32) {
    %c0_i32 = arith.constant 0 : i32
    %c0_i32_0 = arith.constant 0 : i32
    %c0_i32_1 = arith.constant 0 : i32
    return %c0_i32, %c0_i32_0 : i32, i32
  }
  func.func @transform_3(%arg0: i32) -> (i32, i32) {
    %c0_i32 = arith.constant 0 : i32
    %c0_i32_0 = arith.constant 0 : i32
    %c0_i32_1 = arith.constant 0 : i32
    return %c0_i32, %c0_i32_0 : i32, i32
  }
  func.func @transform_4(%arg0: i32) -> (i32, i32) {
    %c0_i32 = arith.constant 0 : i32
    %c0_i32_0 = arith.constant 0 : i32
    %c0_i32_1 = arith.constant 0 : i32
    return %c0_i32, %c0_i32_0 : i32, i32
  }
  func.func @transform_5(%arg0: i32) -> (i32, i32) {
    %c0_i32 = arith.constant 0 : i32
    %c0_i32_0 = arith.constant 0 : i32
    %c0_i32_1 = arith.constant 0 : i32
    return %c0_i32, %c0_i32_0 : i32, i32
  }
  func.func @transform_6(%arg0: i32) -> (i32, i32) {
    %c0_i32 = arith.constant 0 : i32
    %c0_i32_0 = arith.constant 0 : i32
    %c0_i32_1 = arith.constant 0 : i32
    return %c0_i32, %c0_i32_0 : i32, i32
  }
  func.func @transform_7(%arg0: i32) -> (i32, i32) {
    %c0_i32 = arith.constant 0 : i32
    %c0_i32_0 = arith.constant 0 : i32
    return %arg0, %c0_i32 : i32, i32
  }
}

</mosaic_0001>

<bundles_post_ra>
// kernel: tpu_custom_call.1
= control target key start
LH: loop header
LB: loop body
LE: loop exit
PB: predicated region body
PF: predicated region fallthrough
CT: control target
= control target key end

     0   :  { %12 = vsyncpa [#allocation3], 0  ;;  %s463_s0 = inlined_call_operand.vmem [shape: bf16[8,32], index: 0, kind: input, shape index: {}]   ;;  %s464_s1 = inlined_call_operand.vmem [shape: bf16[32,32], index: 1, kind: input, shape index: {}]   ;;  %s465_s2 = inlined_call_operand.vmem [shape: f32[1,32], index: 2, kind: input, shape index: {}]   ;;  %s466_s3 = inlined_call_operand.hbm [shape: bf16[32,32], index: 3, kind: input, shape index: {}]   ;;  %s467_s4 = inlined_call_operand.vmem [shape: f32[1,32], index: 4, kind: input, shape index: {}]   ;;  %s468_s5 = inlined_call_operand.vmem [shape: bf16[32,8], index: 5, kind: input, shape index: {}]   ;;  %s469_s6 = inlined_call_operand.vmem [shape: f32[1,8], index: 6, kind: input, shape index: {}]   ;;  %s470_s7 = inlined_call_operand.hbm [shape: f32[8,8], index: 7, kind: output, shape index: {}]  }
   0x1   :  { %13 = vsyncpa [#allocation4], 0  ;;  %s382_s24 = smov [#allocation2]  }
   0x2   :  { %s25_s25 = sshll.u32 %s382_s24, 4  ;;  %s26_s25 = int_to_ptr.vmem [resolvable:$true] %s25_s25 }
   0x3   :  { %s346_s26 = scalar_lea.vmem %s26_s25, 256  ;;  %p351_p1 = scmp.lt.s32.totalorder %s26_s25, %s26_s25 }
   0x4   :  { %p347_p0 = scmp.ne.s32.totalorder %s26_s25, %s346_s26  ;;  %p352_p2 = scmp.lt.s32.totalorder %s346_s26, %s346_s26 }
   0x6   :  { %p353_p3 = por %p352_p2, %p351_p1 }
   0x8   :  { %p354_p4 = pnand %p353_p3, %p347_p0 }
   0xa   :  { %357 = shalt.err (!%p354_p4)
}
   0xb   :  { %s383_s27 = smov 64   ;;  %s384_s28 = smov 4  }
   0xc   :  { %31 = dma.hbm_to_vmem [thread:$0]  %s466_s3, 256, %s26_s25, [#allocation3], %s383_s27, %s383_s27, %s384_s28  }
   0xd   :  { %378 = dma.done.wait [#allocation3], 256  }
   0xe   :  { %379 = vsyncadd [#allocation3], 4294967040  ;;  %v385_v0 = vmov 0.0   ;;  %vm386_vm0 = vmmov 0   ;;  %v331_v1 = vld [vmem:[%s464_s1 + $0x8] sm:$0xff]   ;;  %v332_v2 = vld [vmem:[%s464_s1] sm:$0xff]  }
   0xf   :  { %299 = vmatprep.subr.bf16.mxu0 %v385_v0  ;;  %303 = vmatprep.mubr.msk.bf16.mxu0 %vm386_vm0, %v385_v0  ;;  %v333_v3 = vld [vmem:[%s463_s0] sm:$0xff]   ;;  %vm72_vm1 = vcmask 261120   ;;  %v334_v4 = vld [vmem:[#allocation2 + $0x8] sm:$0xff]   ;;  %vm257_vm2 = vcmask 64512  }
  0x10   :  { %307 = vmatprep.subr.bf16.mxu1 %v385_v0  ;;  %311 = vmatprep.mubr.msk.bf16.mxu1 %vm386_vm0, %v385_v0  ;;  %v335_v5 = vld [vmem:[#allocation2] sm:$0xff]   ;;  %v336_v16 = vld [vmem:[%s468_s5 + $0x8] sm:$0xff]  }
  0x11   :  { %300 = vmatpush3.bf16.msra.mxu0 %v331_v1  ;;  %308 = vmatpush3.bf16.msra.mxu1 %v334_v4  ;;  %v277_v6 = vld [vmem:[%s465_s2] ss:$0 sm:$0xff] }
  0x12   :  { %301 = vmatprep.subr.bf16.mxu0 %v385_v0  ;;  %309 = vmatprep.subr.bf16.mxu1 %v385_v0  ;;  %v337_v17 = vld [vmem:[%s468_s5] sm:$0xff]  }
  0x13   :  { %v282_v18 = vld [vmem:[%s467_s4] ss:$0 sm:$0xff] }
  0x14   :  { %v286_v28 = vld [vmem:[%s469_s6] ss:$0 sm:$0xff] }
  0x15   :  { %302 = vmatpush3.bf16.msra.mxu0 %v332_v2  ;;  %310 = vmatpush3.bf16.msra.mxu1 %v335_v5 }
  0x16   :  { %315 = vmatprep.subr.bf16.mxu0 %v385_v0 }
  0x18   :  { %304 = vmatmul.mubr.msk.bf16.vlgmr.msra.gmra.mxu0 %vm72_vm1, %v333_v3 }
  0x19   :  { %319 = vmatprep.mubr.msk.bf16.mxu0 %vm386_vm0, %v385_v0  ;;  %316 = vmatpush3.bf16.msra.mxu0 %v336_v16 }
  0x1a   :  { %317 = vmatprep.subr.bf16.mxu0 %v385_v0 }
  0x1d   :  { %318 = vmatpush3.bf16.msra.mxu0 %v337_v17 }
  0xd8   :  { %v110_v7 = vpop.f32.mrf.mxu0 }
  0xd9   :  { %v111_v9 = vadd.f32 %v277_v6, %v110_v7 }
  0xda   :  { %v305_v8 = vpop.f32.mrf.mxu0 }
  0xdb   :  { %v117_v13 = vmax.f32 %v111_v9, 0.0 }
  0xdc   :  { %v113_v10 = vpop.f32.mrf.mxu0 }
  0xdd   :  { %v114_v11 = vadd.f32 %v277_v6, %v113_v10 }
  0xde   :  { %v306_v12 = vpop.f32.mrf.mxu0 }
  0xdf   :  { %v118_v14 = vmax.f32 %v114_v11, 0.0 }
  0xe1   :  { %v119_v15 = vpack.c.bf16 %v118_v14, %v117_v13 }
  0xe3   :  { %312 = vmatmul.mubr.msk.bf16.vlgmr.msra.gmra.mxu1 %vm72_vm1, %v119_v15 }
 0x1a3   :  { %v180_v19 = vpop.f32.mrf.mxu1 }
 0x1a4   :  { %v181_v21 = vadd.f32 %v282_v18, %v180_v19 }
 0x1a5   :  { %v313_v20 = vpop.f32.mrf.mxu1 }
 0x1a6   :  { %v187_v25 = vmax.f32 %v181_v21, 0.0 }
 0x1a7   :  { %v183_v22 = vpop.f32.mrf.mxu1 }
 0x1a8   :  { %v184_v23 = vadd.f32 %v282_v18, %v183_v22 }
 0x1a9   :  { %v314_v24 = vpop.f32.mrf.mxu1 }
 0x1aa   :  { %v188_v26 = vmax.f32 %v184_v23, 0.0 }
 0x1ac   :  { %v189_v27 = vpack.c.bf16 %v188_v26, %v187_v25 }
 0x1ae   :  { %320 = vmatmul.mubr.msk.bf16.vlgmr.msra.gmra.mxu0 %vm72_vm1, %v189_v27 }
 0x26e   :  { %v250_v29 = vpop.f32.mrf.mxu0 }
 0x26f   :  { %v251_v30 = vadd.f32 %v286_v28, %v250_v29 }
 0x270   :  { %v321_v31 = vpop.f32.mrf.mxu0 }
 0x271   :  { %258 = vst.msk [vmem:[#allocation5] sm:$0xff] %vm257_vm2, %v251_v30 }
 0x272   :  { %v253_v32 = vpop.f32.mrf.mxu0 }
 0x273   :  { %v254_v33 = vadd.f32 %v286_v28, %v253_v32 }
 0x274   :  { %v322_v34 = vpop.f32.mrf.mxu0 }
 0x275   :  { %259 = vst.msk [vmem:[#allocation5 + $0x8] sm:$0xff] %vm257_vm2, %v254_v33 }
 0x276   :  { %264 = vsyncadd [#allocation4], 128  ;;  %s387_s4 = smov [#allocation5]  }
 0x277   :  { %s265_s5 = sshll.u32 %s387_s4, 4  ;;  %s266_s5 = int_to_ptr.vmem [resolvable:$true] %s265_s5 }
 0x278   :  { %s358_s20 = scalar_lea.vmem %s266_s5, 128  ;;  %s362_s21 = scalar_lea.vmem %s266_s5, 256 }
 0x279   :  { %p359_p5 = scmp.ne.s32.totalorder %s266_s5, %s358_s20  ;;  %p363_p6 = scmp.lt.s32.totalorder %s266_s5, %s266_s5 }
 0x27a   :  { %p364_p7 = scmp.lt.s32.totalorder %s362_s21, %s358_s20 }
 0x27c   :  { %p365_p8 = por %p364_p7, %p363_p6 }
 0x27e   :  { %p366_p9 = pnand %p365_p8, %p359_p5 }
 0x280   :  { %369 = shalt.err (!%p366_p9)
}
 0x281   :  { %s388_s6 = smov 128   ;;  %s389_s22 = smov 8  }
 0x282   :  { %271 = dma.vmem_to_hbm [thread:$0]  %s266_s5, 128, %s470_s7, [#allocation4], %s388_s6, %s388_s6, %s389_s22  }
 0x283   :  { %380 = dma.done.wait [#allocation4], 256  }
 0x284   :  { %381 = vsyncadd [#allocation4], 4294967040 }
 0x285   :  { %275 = vsyncpa [#allocation3], 1 }
 0x286   :  { %276 = vsyncpa [#allocation4], 1 }

</bundles_post_ra>
